<compile_context>
chip_gen: v7x
topology: tpu7x:2x2x1
jax: 0.10.0
libtpu: 0.0.40
codegen_flags: <defaults>
</compile_context>

<pallas_src>
import numpy as np
import jax
import jax.numpy as jnp
from jax import lax
from jax.experimental import pallas as pl
from jax.experimental.pallas import tpu as pltpu


_KRON_K_MAX_BYTES = 2 * 1024 * 1024      # max size of the kron(S_h^T, S_w^T) constant


def _round_up(n: int, m: int) -> int:
    return ((n + m - 1) // m) * m


def _budgets():
    """(vmem_limit_bytes, data_budget_bytes) tuned to the chip's VMEM capacity."""
    try:
        vmem = int(pltpu.get_tpu_info().vmem_capacity_bytes)
    except Exception:
        vmem = 64 * 1024 * 1024                    # assume the smallest (v7x) if unknown
    if vmem >= 96 * 1024 * 1024:                   # v5e / v6e: 128 MiB physical VMEM
        return 64 * 1024 * 1024, 44 * 1024 * 1024
    # v7x: 64 MiB physical, 32 MiB default scoped limit -> stay inside it.
    return 32 * 1024 * 1024, 20 * 1024 * 1024


def _nearest_selection_matrix(out_size: int, in_size: int) -> np.ndarray:
    """S[o, i] = 1 iff i == floor(o * in / out) (PyTorch size-based 'nearest').

    Built with numpy so it is a compile-time constant (no device ops)."""
    o = np.arange(out_size)
    src = np.minimum((o * in_size) // out_size, in_size - 1)
    return (src[:, None] == np.arange(in_size)[None, :]).astype(np.float32)


def _choose_channel_block(nc: int, per_channel_bytes: int, data_budget: int) -> int:
    """Channels processed per grid step.

    Largest multiple-of-8 block that fits the VMEM data budget, shrunk so the
    grid has >= 8 steps when NC allows (>= 4 per v7x TensorCore) without going
    below ~256 rows/step, and adjusted so a multi-step grid has even length
    (both v7x cores get equal work)."""
    b_max = max(8, (int(data_budget) // max(int(per_channel_bytes), 1)) // 8 * 8)
    target_steps = min(8, max(1, nc // 256))
    if target_steps > 1 and target_steps % 2 == 1:
        target_steps += 1
    b = min(_round_up(pl.cdiv(nc, target_steps), 8), b_max)
    if b >= nc:
        return int(nc)                         # one block == full dim (any NC is legal)
    g = pl.cdiv(nc, b)
    if g > 1 and g % 2 == 1:                   # keep the 'parallel' axis even for v7x
        b = max(8, _round_up(pl.cdiv(nc, g + 1), 8))
        if b >= nc:
            return int(nc)
    return int(b)
    # TODO(synk): spatial sizes so large that even an 8-channel block exceeds
    # VMEM would need an extra spatial grid axis (not needed for these nets).


# ----------------------------- kernels ---------------------------------------


def _upsample_kron_kernel(x_ref, k_ref, o_ref):
    # x_ref: (B, H_in*W_in)   k_ref: (H_in*W_in, H_out*W_out)   o_ref: (B, H_out*W_out)
    o_ref[...] = jnp.dot(
        x_ref[...], k_ref[...], preferred_element_type=jnp.float32
    ).astype(o_ref.dtype)


def _upsample_two_stage_kernel(x_ref, swt_ref, sh_ref, o_ref):
    # x_ref: (B, H_in, W_in)   swt_ref: (W_in, W_out) = S_w^T   sh_ref: (H_out, H_in) = S_h
    # o_ref: (B, H_out, W_out)
    swt = swt_ref[...]
    sh = sh_ref[...]

    def body(b, carry):
        # W stage: one-hot column selection, (H_in, W_in) @ (W_in, W_out)
        r = jnp.dot(x_ref[b], swt, preferred_element_type=jnp.float32)
        # H stage: one-hot row selection, (H_out, H_in) @ (H_in, W_out)
        o_ref[b] = jnp.dot(
            sh, r.astype(sh.dtype), preferred_element_type=jnp.float32
        ).astype(o_ref.dtype)
        return carry

    lax.fori_loop(0, x_ref.shape[0], body, 0)


# ----------------------------- wrapper ----------------------------------------


def upsample_nearest(x: jax.Array, size, *, force_two_stage: bool = False) -> jax.Array:
    """Nearest-neighbour upsample of an NCHW tensor to spatial `size`."""
    N, C, H_in, W_in = x.shape
    H_out, W_out = int(size[0]), int(size[1])
    NC = N * C
    out_dtype = x.dtype

    if x.dtype in (jnp.float32, jnp.bfloat16):
        cdt = x.dtype                  # native dtype; one-hot selection matmul is exact
    else:
        # TODO(synk): integer inputs with |x| >= 2**24 lose exactness through the
        # f32 one-hot-matmul path; a DMA/gather path would be bit exact.
        cdt = jnp.float32
    isz = jnp.dtype(cdt).itemsize
    osz = jnp.dtype(out_dtype).itemsize

    vmem_limit, data_budget = _budgets()
    compiler_params = pltpu.CompilerParams(
        dimension_semantics=("parallel",),
        vmem_limit_bytes=vmem_limit,
    )

    in_feat = H_in * W_in
    out_feat = H_out * W_out

    # Kron path spends ~2*in_feat MXU flops per output element -> keep it only
    # while it stays HBM-bound.  Lower threshold for f32 (v5e f32 MXU rate).
    in_feat_max = 128 if isz >= 4 else 256
    use_kron = (
        (not force_two_stage)
        and in_feat <= in_feat_max
        and in_feat * out_feat * isz <= _KRON_K_MAX_BYTES
    )

    if use_kron:
        # Single matmul: out2d = x2d @ kron(S_h^T, S_w^T); lane-dense output slab.
        s_h = _nearest_selection_matrix(H_out, H_in)
        s_w = _nearest_selection_matrix(W_out, W_in)
        k_np = np.kron(s_h.T, s_w.T).astype(np.dtype(cdt))     # (in_feat, out_feat)

        rin, rout = _round_up(in_feat, 128), _round_up(out_feat, 128)
        per_ch = 2 * (rin * isz + rout * osz) + rout * 4       # dbl-buf in/out + f32 acc
        k_vmem = 2 * _round_up(in_feat, 8) * rout * isz        # constant, worst-case 2 bufs
        # TODO(synk): pl.Buffered(1) on the constant operand would halve k_vmem.
        B = _choose_channel_block(NC, per_ch, data_budget - k_vmem)
        G = pl.cdiv(NC, B)

        x2 = x.reshape(NC, in_feat)
        if x2.dtype != cdt:
            x2 = x2.astype(cdt)

        out2 = pl.pallas_call(
            _upsample_kron_kernel,
            out_shape=jax.ShapeDtypeStruct((NC, out_feat), out_dtype),
            grid_spec=pltpu.PrefetchScalarGridSpec(
                num_scalar_prefetch=0,
                grid=(G,),
                in_specs=[
                    pl.BlockSpec((B, in_feat), lambda i: (i, 0)),
                    # constant block index -> fetched once, VMEM-resident
                    pl.BlockSpec((in_feat, out_feat), lambda i: (0, 0)),
                ],
                out_specs=pl.BlockSpec((B, out_feat), lambda i: (i, 0)),
            ),
            compiler_params=compiler_params,
        )(x2, k_np)
        return out2.reshape(N, C, H_out, W_out)

    # Two-stage path (large spatial).  Per channel:
    #     r   = x[c] @ S_w^T    (H_in,  W_out)
    #     out = S_h  @ r        (H_out, W_out)
    # No kron(I_B, S_h): MXU flops are O(B), no big operand pinned in VMEM.
    s_h_np = np.ascontiguousarray(
        _nearest_selection_matrix(H_out, H_in).astype(np.dtype(cdt)))        # (H_out, H_in)
    s_wt_np = np.ascontiguousarray(
        _nearest_selection_matrix(W_out, W_in).T.astype(np.dtype(cdt)))      # (W_in, W_out)

    rwin, rwout = _round_up(W_in, 128), _round_up(W_out, 128)
    rhin, rhout = _round_up(H_in, 8), _round_up(H_out, 8)
    per_ch = 2 * (rhin * rwin * isz + rhout * rwout * osz)     # dbl-buffered in + out
    const_vmem = (2 * _round_up(W_in, 8) * rwout * isz         # S_w^T (worst-case 2 bufs)
                  + 2 * rhout * _round_up(H_in, 128) * isz     # S_h
                  + rhin * rwout * (4 + isz))                  # f32 intermediate r + cast
    B = _choose_channel_block(NC, per_ch, data_budget - const_vmem)
    G = pl.cdiv(NC, B)

    x3 = x.reshape(NC, H_in, W_in)
    if x3.dtype != cdt:
        x3 = x3.astype(cdt)

    out3 = pl.pallas_call(
        _upsample_two_stage_kernel,
        out_shape=jax.ShapeDtypeStruct((NC, H_out, W_out), out_dtype),
        grid_spec=pltpu.PrefetchScalarGridSpec(
            num_scalar_prefetch=0,
            grid=(G,),
            in_specs=[
                pl.BlockSpec((B, H_in, W_in), lambda i: (i, 0, 0)),
                pl.BlockSpec((W_in, W_out), lambda i: (0, 0)),   # VMEM-resident
                pl.BlockSpec((H_out, H_in), lambda i: (0, 0)),   # VMEM-resident
            ],
            out_specs=pl.BlockSpec((B, H_out, W_out), lambda i: (i, 0, 0)),
        ),
        compiler_params=compiler_params,
    )(x3, s_wt_np, s_h_np)
    return out3.reshape(N, C, H_out, W_out)


class Upsample:
    """Mirror of abstract_layers.Upsample for plain-tensor (jnp.ndarray) inputs.

    Only mode='nearest' is implemented as a Pallas kernel.
    # TODO(synk): 'bilinear'/'bicubic'/'area' modes and AbstractElement inputs
    # (box/zonotope propagation) are not implemented here.
    """

    def __init__(self, size, mode="nearest", align_corners=False,
                 consolidate_errors=False):
        self.size = (size, size) if isinstance(size, int) else tuple(size)
        self.mode = mode
        self.align_corners = None if mode in ["nearest", "area"] else align_corners
        self.consolidate_errors = consolidate_errors
        if mode != "nearest":
            raise NotImplementedError("Only mode='nearest' is implemented.")

    def __call__(self, x):
        return upsample_nearest(x, self.size)

    forward = __call__


def _reference_upsample_nearest(x, size):
    """Pure-JAX reference reproducing F.interpolate(..., mode='nearest')."""
    N, C, H_in, W_in = x.shape
    H_out, W_out = size
    hi = jnp.minimum((jnp.arange(H_out) * H_in) // H_out, H_in - 1)
    wi = jnp.minimum((jnp.arange(W_out) * W_in) // W_out, W_in - 1)
    return x[:, :, hi, :][:, :, :, wi]


if __name__ == "__main__":
    key = jax.random.PRNGKey(0)
    N, C, H, W = 2, 4, 8, 8

    x_f32 = jax.random.normal(key, (N, C, H, W), dtype=jnp.float32)
    x_bf16 = x_f32.astype(jnp.bfloat16)

    # 1) integer scale factor, f32, single-matmul (kron) path
    size = (16, 16)
    out = jax.block_until_ready(Upsample(size=size, mode="nearest")(x_f32))
    ref = _reference_upsample_nearest(x_f32, size)
    assert out.shape == (N, C, 16, 16) and out.dtype == x_f32.dtype, out.shape
    assert jnp.allclose(out, ref), "kron path (f32) mismatch vs reference"

    # 2) native bf16 path (no forced f32 cast)
    out_bf = jax.block_until_ready(Upsample(size=size, mode="nearest")(x_bf16))
    ref_bf = _reference_upsample_nearest(x_bf16, size)
    assert out_bf.dtype == jnp.bfloat16
    assert jnp.allclose(out_bf.astype(jnp.float32), ref_bf.astype(jnp.float32)), \
        "bf16 path mismatch vs reference"

    # 3) non-integer scale factors
    size2 = (12, 20)
    out2 = jax.block_until_ready(Upsample(size=size2, mode="nearest")(x_f32))
    ref2 = _reference_upsample_nearest(x_f32, size2)
    assert jnp.allclose(out2, ref2), "non-integer-scale mismatch vs reference"

    # 4) two-stage fallback path (large spatial sizes) + odd channel count
    x_ts = jax.random.normal(jax.random.PRNGKey(1), (2, 5, 8, 8), dtype=jnp.float32)
    out3 = jax.block_until_ready(upsample_nearest(x_ts, size, force_two_stage=True))
    ref3 = _reference_upsample_nearest(x_ts, size)
    assert jnp.allclose(out3, ref3), "two-stage path mismatch vs reference"

    # 5) multi-step grid with a ragged (masked) last channel block, no padding
    x_rag = jax.random.normal(jax.random.PRNGKey(2), (2, 260, 8, 8), dtype=jnp.float32)
    out4 = jax.block_until_ready(upsample_nearest(x_rag, size))
    ref4 = _reference_upsample_nearest(x_rag, size)
    assert jnp.allclose(out4, ref4), "ragged channel-block mismatch vs reference"

    print("KERNEL_OK")
</pallas_src>

<mosaic_0001>
module attributes {stable_mosaic.version = 11 : i64} {
  func.func @_upsample_kron_kernel(%arg0: i32, %arg1: memref<8x64xf32, #tpu.memory_space<vmem>>, %arg2: memref<64x256xf32, #tpu.memory_space<vmem>>, %arg3: memref<8x256xf32, #tpu.memory_space<vmem>>) attributes {dimension_semantics = [#tpu.dimension_semantics<parallel>], iteration_bounds = array<i64: 1>, scalar_prefetch = 0 : i64, scratch_operands = 0 : i64, tpu.core_type = #tpu.core_type<tc>, window_params = [{transform_indices = @transform_0, window_bounds = array<i64: 8, 64>}, {pipeline_mode = #tpu.pipeline_mode<synchronous>, transform_indices = @transform_1, window_bounds = array<i64: 64, 256>}, {transform_indices = @transform_2, window_bounds = array<i64: 8, 256>}]} {
    %c0 = arith.constant 0 : index
    %c0_0 = arith.constant 0 : index
    %0 = vector.load %arg1[%c0, %c0_0] : memref<8x64xf32, #tpu.memory_space<vmem>>, vector<8x64xf32>
    %c0_1 = arith.constant 0 : index
    %c0_2 = arith.constant 0 : index
    %1 = vector.load %arg2[%c0_1, %c0_2] : memref<64x256xf32, #tpu.memory_space<vmem>>, vector<64x256xf32>
    %cst = arith.constant dense<0.000000e+00> : vector<8x256xf32>
    %2 = tpu.matmul %0, %1, %cst {dimension_numbers = #tpu.dot_dimension_numbers<[1], [0], [0], [1], [0, 0, 1, 1], [], []>} : vector<8x64xf32>, vector<64x256xf32>, vector<8x256xf32> -> vector<8x256xf32>
    %c0_3 = arith.constant 0 : index
    %c0_4 = arith.constant 0 : index
    %3 = vector.load %arg3[%c0_3, %c0_4] : memref<8x256xf32, #tpu.memory_space<vmem>>, vector<8x256xf32>
    tpu.vector_store %arg3[%c0_3, %c0_4], %2 {strides = array<i32>} : memref<8x256xf32, #tpu.memory_space<vmem>>, vector<8x256xf32>,
    return
  }
  func.func @transform_0(%arg0: i32) -> (i32, i32) {
    %c0_i32 = arith.constant 0 : i32
    %c0_i32_0 = arith.constant 0 : i32
    return %arg0, %c0_i32 : i32, i32
  }
  func.func @transform_1(%arg0: i32) -> (i32, i32) {
    %c0_i32 = arith.constant 0 : i32
    %c0_i32_0 = arith.constant 0 : i32
    %c0_i32_1 = arith.constant 0 : i32
    return %c0_i32, %c0_i32_0 : i32, i32
  }
  func.func @transform_2(%arg0: i32) -> (i32, i32) {
    %c0_i32 = arith.constant 0 : i32
    %c0_i32_0 = arith.constant 0 : i32
    return %arg0, %c0_i32 : i32, i32
  }
}

</mosaic_0001>

<bundles_post_ra>
// kernel: tpu_custom_call.1
= control target key start
LH: loop header
LB: loop body
LE: loop exit
PB: predicated region body
PF: predicated region fallthrough
CT: control target
= control target key end

     0   :  { %7 = vsyncpa [#allocation3], 0  ;;  %s307_s0 = inlined_call_operand.hbm [shape: f32[8,64], index: 0, kind: input, shape index: {}]   ;;  %s308_s1 = inlined_call_operand.hbm [shape: f32[64,256], index: 1, kind: input, shape index: {}]   ;;  %s309_s2 = inlined_call_operand.hbm [shape: f32[8,256], index: 2, kind: output, shape index: {}]  }
   0x1   :  { %8 = vsyncpa [#allocation6], 0 }
   0x2   :  { %9 = vsyncpa [#allocation4], 0  ;;  %s243_s9 = smov [#allocation2]   ;;  %s244_s11 = smov [#allocation5]  }
   0x3   :  { %s16_s10 = sshll.u32 %s243_s9, 4  ;;  %s25_s12 = sshll.u32 %s244_s11, 4  ;;  %s17_s10 = int_to_ptr.vmem [resolvable:$true] %s16_s10  ;;  %s264_s12 = int_to_ptr.vmem [resolvable:$true] %s25_s12 }
   0x4   :  { %s171_s15 = scalar_lea.hbm %s307_s0, 128 }
   0x5   :  { %p172_p0 = scmp.ne.s32.totalorder %s307_s0, %s171_s15  ;;  %p175_p1 = scmp.lt.u32.totalorder %s171_s15, %s307_s0 }
   0x7   :  { %p177_p2 = pnand %p175_p1, %p172_p0 }
   0x9   :  { %180 = shalt.err (!%p177_p2)
}
   0xa   :  { %s181_s20 = scalar_lea.vmem %s17_s10, 128  ;;  %p186_p4 = scmp.lt.s32.totalorder %s17_s10, %s17_s10 }
   0xb   :  { %p182_p3 = scmp.ne.s32.totalorder %s17_s10, %s181_s20  ;;  %p187_p5 = scmp.lt.s32.totalorder %s181_s20, %s181_s20 }
   0xd   :  { %p188_p6 = por %p187_p5, %p186_p4 }
   0xf   :  { %p189_p7 = pnand %p188_p6, %p182_p3 }
  0x11   :  { %192 = shalt.err (!%p189_p7)
}
  0x12   :  { %19 = dma.hbm_to_vmem [thread:$0]  %s307_s0, 128, %s17_s10, [#allocation3]  }
  0x13   :  { %s193_s25 = scalar_lea.hbm %s308_s1, 2048 }
  0x14   :  { %p194_p8 = scmp.ne.s32.totalorder %s308_s1, %s193_s25  ;;  %p197_p9 = scmp.lt.u32.totalorder %s193_s25, %s308_s1 }
  0x16   :  { %p199_p10 = pnand %p197_p9, %p194_p8 }
  0x18   :  { %202 = shalt.err (!%p199_p10)
}
  0x19   :  { %s203_s30 = scalar_lea.vmem %s264_s12, 2048  ;;  %p208_p12 = scmp.lt.s32.totalorder %s264_s12, %s264_s12 }
  0x1a   :  { %p204_p11 = scmp.ne.s32.totalorder %s264_s12, %s203_s30  ;;  %p209_p13 = scmp.lt.s32.totalorder %s203_s30, %s203_s30 }
  0x1c   :  { %p210_p0 = por %p209_p13, %p208_p12 }
  0x1e   :  { %p211_p1 = pnand %p210_p0, %p204_p11 }
  0x20   :  { %214 = shalt.err (!%p211_p1)
}
  0x21   :  { %s245_s0 = smov 256   ;;  %s246_s3 = smov 16  }
  0x22   :  { %31 = dma.hbm_to_vmem [thread:$0]  %s308_s1, 2048, %s264_s12, [#allocation6], %s245_s0, %s245_s0, %s246_s3  }
  0x23   :  { %237 = dma.done.wait [#allocation3], 128  }
  0x24   :  { %238 = vsyncadd [#allocation3], 4294967168 }
  0x25   :  { %239 = dma.done.wait [#allocation6], 2048  }
  0x26   :  { %240 = vsyncadd [#allocation6], 4294965248  ;;  %v247_v0 = vmov 0.0   ;;  %v40_v1 = vld [vmem:[#allocation5 + $0x8] sm:$0xff]  ;;  %v42_v2 = vld [vmem:[#allocation5 + $0x18] sm:$0xff]  ;;  %vm55_vm0 = vcmask 523264  }
  0x27   :  { %123 = vmatprep.mubr.f32.mxu0 %v247_v0  ;;  %v39_v3 = vld [vmem:[#allocation5] sm:$0xff]  ;;  %v149_v4 = vpack.c.bf16 %v42_v2, %v40_v1  ;;  %v41_v5 = vld [vmem:[#allocation5 + $0x10] sm:$0xff]  ;;  %v44_v6 = vld [vmem:[#allocation5 + $0x28] sm:$0xff]  ;;  %s248_s1 = smov [#allocation7]  }
  0x28   :  { %v46_v7 = vld [vmem:[#allocation5 + $0x38] sm:$0xff]  ;;  %v151_v8 = vpack.c.bf16 %v41_v5, %v39_v3  ;;  %v43_v10 = vld [vmem:[#allocation5 + $0x20] sm:$0xff]  ;;  %v45_v11 = vld [vmem:[#allocation5 + $0x30] sm:$0xff]  ;;  %s138_s6 = sshll.u32 %s248_s1, 4  ;;  %s139_s6 = int_to_ptr.vmem [resolvable:$true] %s138_s6 }
  0x29   :  { %v153_v9 = vpack.c.bf16 %v46_v7, %v44_v6  ;;  %v48_v12 = vld [vmem:[#allocation5 + $0x48] sm:$0xff]  ;;  %150 = vmatprep.subr.bf16.mxu0 %v149_v4  ;;  %v50_v13 = vld [vmem:[#allocation5 + $0x58] sm:$0xff]  ;;  %v155_v14 = vpack.c.bf16 %v45_v11, %v43_v10  ;;  %v47_v16 = vld [vmem:[#allocation5 + $0x40] sm:$0xff]  ;;  %s215_s7 = scalar_lea.vmem %s139_s6, 256  ;;  %p220_p3 = scmp.lt.s32.totalorder %s139_s6, %s139_s6 }
  0x2a   :  { %152 = vmatpush1.bf16.msra.mxu0 %v151_v8  ;;  %v157_v15 = vpack.c.bf16 %v50_v13, %v48_v12  ;;  %v49_v17 = vld [vmem:[#allocation5 + $0x50] sm:$0xff]  ;;  %v52_v18 = vld [vmem:[#allocation5 + $0x68] sm:$0xff]  ;;  %v54_v19 = vld [vmem:[#allocation5 + $0x78] sm:$0xff]  ;;  %p216_p2 = scmp.ne.s32.totalorder %s139_s6, %s215_s7  ;;  %p221_p4 = scmp.lt.s32.totalorder %s215_s7, %s215_s7 }
  0x2b   :  { %154 = vmatprep.subr.bf16.mxu0 %v153_v9  ;;  %v159_v20 = vpack.c.bf16 %v49_v17, %v47_v16  ;;  %v161_v21 = vpack.c.bf16 %v54_v19, %v52_v18  ;;  %v51_v22 = vld [vmem:[#allocation5 + $0x60] sm:$0xff]  ;;  %v53_v23 = vld [vmem:[#allocation5 + $0x70] sm:$0xff]  ;;  %v38_v25 = vld [vmem:[#allocation2] sm:$0xff] }
  0x2c   :  { %v163_v24 = vpack.c.bf16 %v53_v23, %v51_v22  ;;  %p222_p5 = por %p221_p4, %p220_p3 }
  0x2e   :  { %156 = vmatpush1.bf16.msra.mxu0 %v155_v14  ;;  %p223_p6 = pnand %p222_p5, %p216_p2 }
  0x2f   :  { %158 = vmatprep.subr.bf16.mxu0 %v157_v15 }
  0x32   :  { %160 = vmatpush1.bf16.msra.mxu0 %v159_v20 }
  0x33   :  { %162 = vmatprep.subr.bf16.mxu0 %v161_v21 }
  0x36   :  { %164 = vmatpush1.bf16.msra.mxu0 %v163_v24 }
  0x39   :  { %148 = vmatmul.mubr.msk.f32.vlgmr.msra.gmra.mrb[0].mxu0 %vm55_vm0, %v38_v25 }
 0x10c   :  { %v125_v26 = vpop.f32.mrb[0].mxu0 }
 0x10d   :  { %130 = vst [vmem:[#allocation7] sm:$0xff] %v125_v26  ;;  %v127_v27 = vpop.f32.mrb[1].mxu0 }
 0x10e   :  { %131 = vst [vmem:[#allocation7 + $0x8] sm:$0xff] %v127_v27 }
 0x10f   :  { %226 = shalt.err (!%p223_p6)
}
 0x110   :  { %s227_s10 = scalar_lea.hbm %s309_s2, 256 }
 0x111   :  { %p228_p7 = scmp.ne.s32.totalorder %s309_s2, %s227_s10  ;;  %p231_p8 = scmp.lt.u32.totalorder %s227_s10, %s309_s2 }
 0x113   :  { %p233_p9 = pnand %p231_p8, %p228_p7 }
 0x115   :  { %236 = shalt.err (!%p233_p9)
}
 0x116   :  { %141 = dma.vmem_to_hbm [thread:$0]  %s139_s6, 256, %s309_s2, [#allocation4]  }
 0x117   :  { %241 = dma.done.wait [#allocation4], 256  }
 0x118   :  { %242 = vsyncadd [#allocation4], 4294967040 }
 0x119   :  { %145 = vsyncpa [#allocation3], 1 }
 0x11a   :  { %146 = vsyncpa [#allocation6], 1 }
 0x11b   :  { %147 = vsyncpa [#allocation4], 1 }

</bundles_post_ra>
